<compile_context>
chip_gen: v7x
topology: tpu7x:2x2x1
jax: 0.10.0
libtpu: 0.0.40
codegen_flags: <defaults>
</compile_context>

<pallas_src>
import jax
import jax.numpy as jnp
from jax.experimental import pallas as pl
from jax.experimental.pallas import tpu as pltpu


def _round_up(n, m):
    return ((n + m - 1) // m) * m


def _cdiv(a, b):
    return (a + b - 1) // b


def _make_update_kernel(num_parts, compute_dtype):
    """Kernel: (part_refs..., w1_ref, b1_ref, w2_ref, b2_ref, out_ref).

    All refs are lane-dense ([*, L] with L a multiple-of-128 or full width), so the
    concat below is at vreg-aligned lane offsets (cheap) and stores are unmasked.
    """

    def kernel(*refs):
        part_refs = refs[:num_parts]
        w1_ref, b1_ref, w2_ref, b2_ref, out_ref = refs[num_parts:]

        # Fused concat: one [tm, num_parts*L] bf16 operand, one MXU dot (f32 accum).
        state = jnp.concatenate(
            [p_ref[...].astype(compute_dtype) for p_ref in part_refs], axis=-1)
        h = jnp.dot(state, w1_ref[...], preferred_element_type=jnp.float32)
        h = h + b1_ref[...]                 # f32 bias add (broadcast over rows)

        # SiLU in f32 (sigmoid on EUP, mul on VPU).
        h = h * jax.nn.sigmoid(h)

        # Second linear.
        out = jnp.dot(h.astype(compute_dtype), w2_ref[...],
                      preferred_element_type=jnp.float32)
        out = out + b2_ref[...]
        out_ref[...] = out.astype(out_ref.dtype)

    return kernel


def update_layer_forward(x, bound_mes, upadj_mes, params, *,
                         compute_dtype=jnp.bfloat16, tile_n=4096):
    """Forward pass of UpdateLayer.

    x:         [N, H]
    bound_mes: [N, H] or None
    upadj_mes: [N, H] or None
    params:    dict with w1t [(num_parts)*H, H], b1 [1, H], w2t [H, H], b2 [1, H]
    """
    parts = [x]
    if bound_mes is not None:
        parts.append(bound_mes)
    if upadj_mes is not None:
        parts.append(upadj_mes)
    num_parts = len(parts)

    N, H = x.shape
    F = num_parts * H
    w1t, b1, w2t, b2 = params["w1t"], params["b1"], params["w2t"], params["b2"]
    assert w1t.shape == (F, H), "W1 width must equal (num_mes + 1) * num_hidden"

    # Lane repack factor: present r consecutive rows as one 128-lane-wide row.
    r = 128 // H if (H < 128 and 128 % H == 0) else 1
    L = r * H
    align = 8 * r  # sublane alignment of the row tile in original-row units

    # Row tile: as big as possible (amortize per-step overhead), but keep >= 2 grid
    # steps when N allows it so v7x's two TensorCores both get a share.
    if N >= 2 * align:
        tn = min(tile_n, _round_up(_cdiv(N, 2), align))
    else:
        tn = min(tile_n, _round_up(N, align))
    tn = max(_round_up(tn, align), align)
    n_pad = _round_up(N, tn)
    if n_pad != N:
        parts = [jnp.pad(p, ((0, n_pad - N), (0, 0))) for p in parts]

    tm = tn // r
    # Free row-major repack: [n_pad, H] -> [n_pad//r, r*H] (same HBM bytes).
    parts = [p.reshape(n_pad // r, L) for p in parts]

    # Block-diagonal weight expansion so the lane-dense layout computes the same MLP:
    #   W1_dense[p*L + c*H + k, c'*H + j] = (c == c') * W1[p*H + k, j]
    # Weights cast to bf16 ONCE here; biases stay f32.
    eye_r = jnp.eye(r, dtype=w1t.dtype)
    w1_dense = jnp.concatenate(
        [jnp.kron(eye_r, w1t[p * H:(p + 1) * H, :]) for p in range(num_parts)],
        axis=0).astype(compute_dtype)                        # [num_parts*L, L]
    w2_dense = jnp.kron(eye_r, w2t).astype(compute_dtype)    # [L, L]
    b1_dense = jnp.tile(b1.astype(jnp.float32), (1, r))      # [1, L]
    b2_dense = jnp.tile(b2.astype(jnp.float32), (1, r))      # [1, L]

    grid = (n_pad // tn,)
    act_spec = pl.BlockSpec((tm, L), lambda i: (i, 0))
    # TODO(synk): pipeline_mode=pl.Buffered(1) on the weight specs would document
    # single-buffer residency; omitted for maximally portable lowering (weights are tiny).
    in_specs = [act_spec] * num_parts + [
        pl.BlockSpec((num_parts * L, L), lambda i: (0, 0)),  # W1 (VMEM-resident)
        pl.BlockSpec((1, L), lambda i: (0, 0)),              # b1
        pl.BlockSpec((L, L), lambda i: (0, 0)),              # W2
        pl.BlockSpec((1, L), lambda i: (0, 0)),              # b2
    ]
    out_spec = pl.BlockSpec((tm, L), lambda i: (i, 0))

    in_itemsize = jnp.dtype(x.dtype).itemsize
    w_itemsize = jnp.dtype(compute_dtype).itemsize
    cost = pl.CostEstimate(
        flops=2 * n_pad * (num_parts + 1) * H * L,           # includes block-diag zeros
        transcendentals=n_pad * H,                           # sigmoid
        bytes_accessed=(n_pad * F + n_pad * H) * in_itemsize
                       + (num_parts * L * L + L * L) * w_itemsize
                       + 2 * L * 4,
    )

    # VMEM budget: double-buffered activation + output tiles, resident weights, headroom.
    vmem_bytes = (2 * num_parts * tm * L * in_itemsize       # input tiles (x2 buffers)
                  + 2 * tm * L * in_itemsize                 # output tiles (x2 buffers)
                  + (num_parts * L * L + L * L) * w_itemsize
                  + 4 * L * 4
                  + (2 << 20))                               # headroom
    vmem_bytes = int(min(max(vmem_bytes, 4 << 20), 60 << 20))

    out_dense = pl.pallas_call(
        _make_update_kernel(num_parts, compute_dtype),
        out_shape=jax.ShapeDtypeStruct((n_pad // r, L), x.dtype),
        grid=grid,
        in_specs=in_specs,
        out_specs=out_spec,
        compiler_params=pltpu.CompilerParams(
            dimension_semantics=("parallel",),
            vmem_limit_bytes=vmem_bytes,
        ),
        cost_estimate=cost,
    )(*parts, w1_dense, b1_dense, w2_dense, b2_dense)

    out = out_dense.reshape(n_pad, H)
    return out[:N] if n_pad != N else out


def init_params(key, num_hidden, num_mes, dtype=jnp.float32):
    """Init mimicking nn.Linear: W1 [H, (M+1)H], b1 [H], W2 [H, H], b2 [H]
    (stored transposed / reshaped for the kernel)."""
    in1 = (num_mes + 1) * num_hidden
    k1, k2, k3, k4 = jax.random.split(key, 4)
    lim1 = 1.0 / jnp.sqrt(in1)
    lim2 = 1.0 / jnp.sqrt(num_hidden)
    w1 = jax.random.uniform(k1, (num_hidden, in1), dtype, -lim1, lim1)
    b1 = jax.random.uniform(k2, (num_hidden,), dtype, -lim1, lim1)
    w2 = jax.random.uniform(k3, (num_hidden, num_hidden), dtype, -lim2, lim2)
    b2 = jax.random.uniform(k4, (num_hidden,), dtype, -lim2, lim2)
    return {
        "w1t": w1.T,                  # [(M+1)*H, H]
        "b1": b1.reshape(1, -1),      # [1, H]
        "w2t": w2.T,                  # [H, H]
        "b2": b2.reshape(1, -1),      # [1, H]
    }


def _reference(x, bound_mes, upadj_mes, params, compute_dtype=jnp.bfloat16):
    """Pure-JAX reference mirroring the kernel's bf16-matmul / f32-accumulate math."""
    parts = [x]
    if bound_mes is not None:
        parts.append(bound_mes)
    if upadj_mes is not None:
        parts.append(upadj_mes)
    state = jnp.concatenate(parts, axis=1)
    h = jnp.dot(state.astype(compute_dtype), params["w1t"].astype(compute_dtype),
                preferred_element_type=jnp.float32) + params["b1"]
    h = h * jax.nn.sigmoid(h)
    out = jnp.dot(h.astype(compute_dtype), params["w2t"].astype(compute_dtype),
                  preferred_element_type=jnp.float32) + params["b2"]
    return out.astype(x.dtype)


if __name__ == "__main__":
    num_hidden = 32
    num_mes = 2      # (num_mes + 1) * num_hidden = 96 input features

    key = jax.random.PRNGKey(0)
    kp, kd = jax.random.split(key)
    params = init_params(kp, num_hidden, num_mes)

    # Cases: tiny single-tile, medium (2-step grid + row padding), and a forced
    # multi-step grid with a smaller explicit tile.
    cases = ((8, {}), (200, {}), (1000, {"tile_n": 256}))
    for N, kwargs in cases:
        kx, kb, ku, kd = jax.random.split(kd, 4)
        x = jax.random.normal(kx, (N, num_hidden), jnp.float32)
        bound_mes = jax.random.normal(kb, (N, num_hidden), jnp.float32)
        upadj_mes = jax.random.normal(ku, (N, num_hidden), jnp.float32)

        out = update_layer_forward(x, bound_mes, upadj_mes, params, **kwargs)
        out = jax.block_until_ready(out)

        ref = _reference(x, bound_mes, upadj_mes, params)
        assert out.shape == (N, num_hidden)
        err = float(jnp.max(jnp.abs(out - ref)))
        assert jnp.allclose(out, ref, atol=1e-2, rtol=1e-2), \
            f"mismatch vs reference (N={N}): max abs err {err}"

    print("KERNEL_OK")
</pallas_src>

<mosaic_0001>
module attributes {stable_mosaic.version = 11 : i64} {
  func.func @kernel(%arg0: i32, %arg1: memref<8x128xf32, #tpu.memory_space<vmem>>, %arg2: memref<8x128xf32, #tpu.memory_space<vmem>>, %arg3: memref<8x128xf32, #tpu.memory_space<vmem>>, %arg4: memref<384x128xbf16, #tpu.memory_space<vmem>>, %arg5: memref<1x128xf32, #tpu.memory_space<vmem>>, %arg6: memref<128x128xbf16, #tpu.memory_space<vmem>>, %arg7: memref<1x128xf32, #tpu.memory_space<vmem>>, %arg8: memref<8x128xf32, #tpu.memory_space<vmem>>) attributes {dimension_semantics = [#tpu.dimension_semantics<parallel>], iteration_bounds = array<i64: 1>, scalar_prefetch = 0 : i64, scratch_operands = 0 : i64, tpu.core_type = #tpu.core_type<tc>, window_params = [{transform_indices = @transform_0, window_bounds = array<i64: 8, 128>}, {transform_indices = @transform_1, window_bounds = array<i64: 8, 128>}, {transform_indices = @transform_2, window_bounds = array<i64: 8, 128>}, {pipeline_mode = #tpu.pipeline_mode<synchronous>, transform_indices = @transform_3, window_bounds = array<i64: 384, 128>}, {pipeline_mode = #tpu.pipeline_mode<synchronous>, transform_indices = @transform_4, window_bounds = array<i64: 1, 128>}, {pipeline_mode = #tpu.pipeline_mode<synchronous>, transform_indices = @transform_5, window_bounds = array<i64: 128, 128>}, {pipeline_mode = #tpu.pipeline_mode<synchronous>, transform_indices = @transform_6, window_bounds = array<i64: 1, 128>}, {transform_indices = @transform_7, window_bounds = array<i64: 8, 128>}]} {
    %c0 = arith.constant 0 : index
    %c0_0 = arith.constant 0 : index
    %0 = vector.load %arg1[%c0, %c0_0] : memref<8x128xf32, #tpu.memory_space<vmem>>, vector<8x128xf32>
    %1 = arith.truncf %0 : vector<8x128xf32> to vector<8x128xbf16>
    %c0_1 = arith.constant 0 : index
    %c0_2 = arith.constant 0 : index
    %2 = vector.load %arg2[%c0_1, %c0_2] : memref<8x128xf32, #tpu.memory_space<vmem>>, vector<8x128xf32>
    %3 = arith.truncf %2 : vector<8x128xf32> to vector<8x128xbf16>
    %c0_3 = arith.constant 0 : index
    %c0_4 = arith.constant 0 : index
    %4 = vector.load %arg3[%c0_3, %c0_4] : memref<8x128xf32, #tpu.memory_space<vmem>>, vector<8x128xf32>
    %5 = arith.truncf %4 : vector<8x128xf32> to vector<8x128xbf16>
    %6 = tpu.concatenate %1, %3, %5 in 1 : vector<8x128xbf16>, vector<8x128xbf16>, vector<8x128xbf16> -> vector<8x384xbf16>
    %c0_5 = arith.constant 0 : index
    %c0_6 = arith.constant 0 : index
    %7 = vector.load %arg4[%c0_5, %c0_6] : memref<384x128xbf16, #tpu.memory_space<vmem>>, vector<384x128xbf16>
    %cst = arith.constant dense<0.000000e+00> : vector<8x128xf32>
    %8 = tpu.matmul %6, %7, %cst {dimension_numbers = #tpu.dot_dimension_numbers<[1], [0], [0], [1], [0, 0, 1, 1], [], []>} : vector<8x384xbf16>, vector<384x128xbf16>, vector<8x128xf32> -> vector<8x128xf32>
    %c0_7 = arith.constant 0 : index
    %c0_8 = arith.constant 0 : index
    %9 = vector.load %arg5[%c0_7, %c0_8] : memref<1x128xf32, #tpu.memory_space<vmem>>, vector<1x128xf32>
    %10 = vector.broadcast %9 : vector<1x128xf32> to vector<8x128xf32>
    %11 = arith.addf %8, %10 : vector<8x128xf32>
    %12 = arith.negf %11 : vector<8x128xf32>
    %13 = math.exp %12 : vector<8x128xf32>
    %cst_9 = arith.constant 1.000000e+00 : f32
    %14 = vector.broadcast %cst_9 : f32 to vector<8x128xf32>
    %15 = arith.addf %14, %13 : vector<8x128xf32>
    %16 = arith.divf %14, %15 : vector<8x128xf32>
    %17 = arith.mulf %11, %16 : vector<8x128xf32>
    %18 = arith.truncf %17 : vector<8x128xf32> to vector<8x128xbf16>
    %c0_10 = arith.constant 0 : index
    %c0_11 = arith.constant 0 : index
    %19 = vector.load %arg6[%c0_10, %c0_11] : memref<128x128xbf16, #tpu.memory_space<vmem>>, vector<128x128xbf16>
    %cst_12 = arith.constant dense<0.000000e+00> : vector<8x128xf32>
    %20 = tpu.matmul %18, %19, %cst_12 {dimension_numbers = #tpu.dot_dimension_numbers<[1], [0], [0], [1], [0, 0, 1, 1], [], []>} : vector<8x128xbf16>, vector<128x128xbf16>, vector<8x128xf32> -> vector<8x128xf32>
    %c0_13 = arith.constant 0 : index
    %c0_14 = arith.constant 0 : index
    %21 = vector.load %arg7[%c0_13, %c0_14] : memref<1x128xf32, #tpu.memory_space<vmem>>, vector<1x128xf32>
    %22 = vector.broadcast %21 : vector<1x128xf32> to vector<8x128xf32>
    %23 = arith.addf %20, %22 : vector<8x128xf32>
    %c0_15 = arith.constant 0 : index
    %c0_16 = arith.constant 0 : index
    %24 = vector.load %arg8[%c0_15, %c0_16] : memref<8x128xf32, #tpu.memory_space<vmem>>, vector<8x128xf32>
    tpu.vector_store %arg8[%c0_15, %c0_16], %23 {strides = array<i32>} : memref<8x128xf32, #tpu.memory_space<vmem>>, vector<8x128xf32>,
    return
  }
  func.func @transform_0(%arg0: i32) -> (i32, i32) {
    %c0_i32 = arith.constant 0 : i32
    %c0_i32_0 = arith.constant 0 : i32
    return %arg0, %c0_i32 : i32, i32
  }
  func.func @transform_1(%arg0: i32) -> (i32, i32) {
    %c0_i32 = arith.constant 0 : i32
    %c0_i32_0 = arith.constant 0 : i32
    return %arg0, %c0_i32 : i32, i32
  }
  func.func @transform_2(%arg0: i32) -> (i32, i32) {
    %c0_i32 = arith.constant 0 : i32
    %c0_i32_0 = arith.constant 0 : i32
    return %arg0, %c0_i32 : i32, i32
  }
  func.func @transform_3(%arg0: i32) -> (i32, i32) {
    %c0_i32 = arith.constant 0 : i32
    %c0_i32_0 = arith.constant 0 : i32
    %c0_i32_1 = arith.constant 0 : i32
    return %c0_i32, %c0_i32_0 : i32, i32
  }
  func.func @transform_4(%arg0: i32) -> (i32, i32) {
    %c0_i32 = arith.constant 0 : i32
    %c0_i32_0 = arith.constant 0 : i32
    %c0_i32_1 = arith.constant 0 : i32
    return %c0_i32, %c0_i32_0 : i32, i32
  }
  func.func @transform_5(%arg0: i32) -> (i32, i32) {
    %c0_i32 = arith.constant 0 : i32
    %c0_i32_0 = arith.constant 0 : i32
    %c0_i32_1 = arith.constant 0 : i32
    return %c0_i32, %c0_i32_0 : i32, i32
  }
  func.func @transform_6(%arg0: i32) -> (i32, i32) {
    %c0_i32 = arith.constant 0 : i32
    %c0_i32_0 = arith.constant 0 : i32
    %c0_i32_1 = arith.constant 0 : i32
    return %c0_i32, %c0_i32_0 : i32, i32
  }
  func.func @transform_7(%arg0: i32) -> (i32, i32) {
    %c0_i32 = arith.constant 0 : i32
    %c0_i32_0 = arith.constant 0 : i32
    return %arg0, %c0_i32 : i32, i32
  }
}

</mosaic_0001>

<bundles_post_ra>
// kernel: tpu_custom_call.1
= control target key start
LH: loop header
LB: loop body
LE: loop exit
PB: predicated region body
PF: predicated region fallthrough
CT: control target
= control target key end

     0   :  { %12 = vsyncpa [#allocation3], 0  ;;  %s974_s0 = inlined_call_operand.hbm [shape: f32[8,128], index: 0, kind: input, shape index: {}]   ;;  %s975_s1 = inlined_call_operand.hbm [shape: f32[8,128], index: 1, kind: input, shape index: {}]   ;;  %s976_s2 = inlined_call_operand.hbm [shape: f32[8,128], index: 2, kind: input, shape index: {}]   ;;  %s977_s3 = inlined_call_operand.hbm [shape: bf16[384,128], index: 3, kind: input, shape index: {}]   ;;  %s978_s4 = inlined_call_operand.vmem [shape: f32[1,128], index: 4, kind: input, shape index: {}]   ;;  %s979_s5 = inlined_call_operand.hbm [shape: bf16[128,128], index: 5, kind: input, shape index: {}]   ;;  %s980_s6 = inlined_call_operand.vmem [shape: f32[1,128], index: 6, kind: input, shape index: {}]   ;;  %s981_s7 = inlined_call_operand.hbm [shape: f32[8,128], index: 7, kind: output, shape index: {}]  }
   0x1   :  { %13 = vsyncpa [#allocation6], 0 }
   0x2   :  { %14 = vsyncpa [#allocation9], 0 }
   0x3   :  { %15 = vsyncpa [#allocation4], 0  ;;  %s813_s24 = smov [#allocation5]   ;;  %s814_s26 = smov [#allocation8]  }
   0x4   :  { %s32_s25 = sshll.u32 %s813_s24, 4  ;;  %s51_s27 = sshll.u32 %s814_s26, 4  ;;  %s33_s25 = int_to_ptr.vmem [resolvable:$true] %s32_s25  ;;  %s863_s27 = int_to_ptr.vmem [resolvable:$true] %s51_s27 }
   0x5   :  { %s673_s30 = scalar_lea.hbm %s975_s1, 128 }
   0x6   :  { %p674_p0 = scmp.ne.s32.totalorder %s975_s1, %s673_s30  ;;  %p677_p1 = scmp.lt.u32.totalorder %s673_s30, %s975_s1 }
   0x8   :  { %p679_p2 = pnand %p677_p1, %p674_p0 }
   0xa   :  { %682 = shalt.err (!%p679_p2)
}
   0xb   :  { %s683_s12 = scalar_lea.vmem %s33_s25, 128  ;;  %p688_p4 = scmp.lt.s32.totalorder %s33_s25, %s33_s25 }
   0xc   :  { %p684_p3 = scmp.ne.s32.totalorder %s33_s25, %s683_s12  ;;  %p689_p5 = scmp.lt.s32.totalorder %s683_s12, %s683_s12 }
   0xe   :  { %p690_p6 = por %p689_p5, %p688_p4 }
  0x10   :  { %p691_p7 = pnand %p690_p6, %p684_p3 }
  0x12   :  { %694 = shalt.err (!%p691_p7)
}
  0x13   :  { %35 = dma.hbm_to_vmem [thread:$0]  %s975_s1, 128, %s33_s25, [#allocation6]  }
  0x14   :  { %s695_s17 = scalar_lea.hbm %s977_s3, 3072 }
  0x15   :  { %p696_p8 = scmp.ne.s32.totalorder %s977_s3, %s695_s17  ;;  %p699_p9 = scmp.lt.u32.totalorder %s695_s17, %s977_s3 }
  0x17   :  { %p701_p10 = pnand %p699_p9, %p696_p8 }
  0x19   :  { %704 = shalt.err (!%p701_p10)
}
  0x1a   :  { %s705_s22 = scalar_lea.vmem %s863_s27, 3072  ;;  %p710_p12 = scmp.lt.s32.totalorder %s863_s27, %s863_s27 }
  0x1b   :  { %p706_p11 = scmp.ne.s32.totalorder %s863_s27, %s705_s22  ;;  %p711_p13 = scmp.lt.s32.totalorder %s705_s22, %s705_s22 }
  0x1d   :  { %p712_p0 = por %p711_p13, %p710_p12 }
  0x1f   :  { %p713_p1 = pnand %p712_p0, %p706_p11 }
  0x21   :  { %716 = shalt.err (!%p713_p1)
}
  0x22   :  { %s815_s1 = smov 64   ;;  %s816_s23 = smov 4  }
  0x23   :  { %57 = dma.hbm_to_vmem [thread:$0]  %s977_s3, 3072, %s863_s27, [#allocation9], %s815_s1, %s815_s1, %s816_s23  }
  0x24   :  { %s817_s26 = smov [#allocation2]   ;;  %s818_s29 = smov [#allocation7]  }
  0x25   :  { %s22_s28 = sshll.u32 %s817_s26, 4  ;;  %s42_s30 = sshll.u32 %s818_s29, 4  ;;  %s23_s28 = int_to_ptr.vmem [resolvable:$true] %s22_s28  ;;  %s43_s30 = int_to_ptr.vmem [resolvable:$true] %s42_s30 }
  0x26   :  { %s717_s10 = scalar_lea.hbm %s974_s0, 128 }
  0x27   :  { %p718_p2 = scmp.ne.s32.totalorder %s974_s0, %s717_s10  ;;  %p721_p3 = scmp.lt.u32.totalorder %s717_s10, %s974_s0 }
  0x29   :  { %p723_p4 = pnand %p721_p3, %p718_p2 }
  0x2b   :  { %726 = shalt.err (!%p723_p4)
}
  0x2c   :  { %s727_s3 = scalar_lea.vmem %s23_s28, 128  ;;  %p732_p6 = scmp.lt.s32.totalorder %s23_s28, %s23_s28 }
  0x2d   :  { %p728_p5 = scmp.ne.s32.totalorder %s23_s28, %s727_s3  ;;  %p733_p7 = scmp.lt.s32.totalorder %s727_s3, %s727_s3 }
  0x2f   :  { %p734_p8 = por %p733_p7, %p732_p6 }
  0x31   :  { %p735_p9 = pnand %p734_p8, %p728_p5 }
  0x33   :  { %738 = shalt.err (!%p735_p9)
}
  0x34   :  { %25 = dma.hbm_to_vmem [thread:$0]  %s974_s0, 128, %s23_s28, [#allocation3]  }
  0x35   :  { %s739_s18 = scalar_lea.hbm %s976_s2, 128 }
  0x36   :  { %p740_p10 = scmp.ne.s32.totalorder %s976_s2, %s739_s18  ;;  %p743_p11 = scmp.lt.u32.totalorder %s739_s18, %s976_s2 }
  0x38   :  { %p745_p12 = pnand %p743_p11, %p740_p10 }
  0x3a   :  { %748 = shalt.err (!%p745_p12)
}
  0x3b   :  { %s749_s24 = scalar_lea.vmem %s43_s30, 128  ;;  %p754_p0 = scmp.lt.s32.totalorder %s43_s30, %s43_s30 }
  0x3c   :  { %p750_p13 = scmp.ne.s32.totalorder %s43_s30, %s749_s24  ;;  %p755_p1 = scmp.lt.s32.totalorder %s749_s24, %s749_s24 }
  0x3e   :  { %p756_p2 = por %p755_p1, %p754_p0 }
  0x40   :  { %p757_p3 = pnand %p756_p2, %p750_p13 }
  0x42   :  { %760 = shalt.err (!%p757_p3)
}
  0x43   :  { %45 = dma.hbm_to_vmem [thread:$0]  %s976_s2, 128, %s43_s30, [#allocation6]  }
  0x44   :  { %s819_s26 = smov [#allocation10]   ;;  %s761_s9 = scalar_lea.hbm %s979_s5, 1024 }
  0x45   :  { %s65_s28 = sshll.u32 %s819_s26, 4  ;;  %p762_p4 = scmp.ne.s32.totalorder %s979_s5, %s761_s9  ;;  %s66_s28 = int_to_ptr.vmem [resolvable:$true] %s65_s28 }
  0x46   :  { %p765_p5 = scmp.lt.u32.totalorder %s761_s9, %s979_s5 }
  0x48   :  { %p767_p6 = pnand %p765_p5, %p762_p4 }
  0x4a   :  { %770 = shalt.err (!%p767_p6)
}
  0x4b   :  { %s771_s14 = scalar_lea.vmem %s66_s28, 1024  ;;  %p776_p8 = scmp.lt.s32.totalorder %s66_s28, %s66_s28 }
  0x4c   :  { %p772_p7 = scmp.ne.s32.totalorder %s66_s28, %s771_s14  ;;  %p777_p9 = scmp.lt.s32.totalorder %s771_s14, %s771_s14 }
  0x4e   :  { %p778_p10 = por %p777_p9, %p776_p8 }
  0x50   :  { %p779_p11 = pnand %p778_p10, %p772_p7 }
  0x52   :  { %782 = shalt.err (!%p779_p11)
}
  0x53   :  { %71 = dma.hbm_to_vmem [thread:$0]  %s979_s5, 1024, %s66_s28, [#allocation9], %s815_s1, %s815_s1, %s816_s23  }
  0x54   :  { %805 = dma.done.wait [#allocation3], 128  }
  0x55   :  { %806 = vsyncadd [#allocation3], 4294967168 }
  0x56   :  { %807 = dma.done.wait [#allocation6], 256  }
  0x57   :  { %808 = vsyncadd [#allocation6], 4294967040 }
  0x58   :  { %809 = dma.done.wait [#allocation9], 4096  }
  0x59   :  { %810 = vsyncadd [#allocation9], 4294963200  ;;  %v820_v0 = vmov 0.0   ;;  %vm821_vm0 = vmmov 0   ;;  %v637_v1 = vld [vmem:[#allocation8 + $0x40] sm:$0xff]   ;;  %v640_v4 = vld [vmem:[#allocation8 + $0x48] sm:$0xff]  }
  0x5a   :  { %587 = vmatprep.subr.bf16.mxu1 %v820_v0  ;;  %603 = vmatprep.mubr.msk.bf16.mxu1 %vm821_vm0, %v820_v0  ;;  %v638_v2 = vld [vmem:[#allocation8] sm:$0xff]   ;;  %v641_v5 = vld [vmem:[#allocation8 + $0x8] sm:$0xff]   ;;  %v643_v7 = vld [vmem:[#allocation8 + $0x50] sm:$0xff]   ;;  %s822_s3 = smov [#allocation11]  }
  0x5b   :  { %547 = vmatprep.subr.bf16.mxu0 %v637_v1  ;;  %v639_v3 = vld [vmem:[#allocation8 + $0x80] sm:$0xff]   ;;  %v642_v6 = vld [vmem:[#allocation8 + $0x88] sm:$0xff]   ;;  %v644_v8 = vld [vmem:[#allocation8 + $0x10] sm:$0xff]   ;;  %s501_s27 = sshll.u32 %s822_s3, 4  ;;  %s502_s27 = int_to_ptr.vmem [resolvable:$true] %s501_s27 }
  0x5c   :  { %548 = vmatpush3.bf16.msra.mxu0 %v638_v2  ;;  %588 = vmatpush3.bf16.msra.mxu1 %v639_v3  ;;  %v645_v9 = vld [vmem:[#allocation8 + $0x90] sm:$0xff]   ;;  %v646_v10 = vld [vmem:[#allocation8 + $0x58] sm:$0xff]   ;;  %v649_v13 = vld [vmem:[#allocation8 + $0x60] sm:$0xff]   ;;  %s783_s15 = scalar_lea.vmem %s502_s27, 128  ;;  %p788_p13 = scmp.lt.s32.totalorder %s502_s27, %s502_s27 }
  0x5d   :  { %549 = vmatprep.subr.bf16.mxu0 %v640_v4  ;;  %589 = vmatprep.subr.bf16.mxu1 %v820_v0  ;;  %v647_v11 = vld [vmem:[#allocation8 + $0x18] sm:$0xff]   ;;  %v650_v14 = vld [vmem:[#allocation8 + $0x20] sm:$0xff]   ;;  %v652_v16 = vld [vmem:[#allocation8 + $0x68] sm:$0xff]   ;;  %p784_p12 = scmp.ne.s32.totalorder %s502_s27, %s783_s15  ;;  %p789_p0 = scmp.lt.s32.totalorder %s783_s15, %s783_s15 }
  0x5e   :  { %v648_v12 = vld [vmem:[#allocation8 + $0x98] sm:$0xff]   ;;  %v651_v15 = vld [vmem:[#allocation8 + $0xa0] sm:$0xff]   ;;  %v653_v17 = vld [vmem:[#allocation8 + $0x28] sm:$0xff]  }
  0x5f   :  { %v654_v18 = vld [vmem:[#allocation8 + $0xa8] sm:$0xff]   ;;  %v655_v19 = vld [vmem:[#allocation8 + $0x70] sm:$0xff]   ;;  %v658_v23 = vld [vmem:[#allocation8 + $0x78] sm:$0xff]   ;;  %p790_p1 = por %p789_p0, %p788_p13 }
  0x60   :  { %550 = vmatpush3.bf16.msra.mxu0 %v641_v5  ;;  %590 = vmatpush3.bf16.msra.mxu1 %v642_v6  ;;  %v656_v20 = vld [vmem:[#allocation8 + $0x30] sm:$0xff]   ;;  %v659_v25 = vld [vmem:[#allocation8 + $0x38] sm:$0xff]   ;;  %v90_v26 = vld [vmem:[#allocation2] sm:$0xff] }
  0x61   :  { %551 = vmatprep.subr.bf16.mxu0 %v643_v7  ;;  %591 = vmatprep.subr.bf16.mxu1 %v820_v0  ;;  %v92_v21 = vld [vmem:[#allocation5] sm:$0xff]  ;;  %v660_v27 = vld [vmem:[#allocation8 + $0xb8] sm:$0xff]   ;;  %v91_v29 = vpack.c.bf16 %v90_v26, %v90_v26  ;;  %v661_v31 = vld [vmem:[#allocation10] sm:$0xff]   ;;  %p791_p2 = pnand %p790_p1, %p784_p12 }
  0x62   :  { %v657_v22 = vld [vmem:[#allocation8 + $0xb0] sm:$0xff]   ;;  %v93_v24 = vpack.c.bf16 %v92_v21, %v92_v21  ;;  %v94_v28 = vld [vmem:[#allocation7] sm:$0xff]  ;;  %v662_v32 = vld [vmem:[#allocation10 + $0x8] sm:$0xff]  }
  0x63   :  { %v95_v30 = vpack.c.bf16 %v94_v28, %v94_v28  ;;  %v663_v33 = vld [vmem:[#allocation10 + $0x10] sm:$0xff]   ;;  %v664_v34 = vld [vmem:[#allocation10 + $0x18] sm:$0xff]   ;;  %v665_v35 = vld [vmem:[#allocation10 + $0x20] sm:$0xff]  }
  0x64   :  { %552 = vmatpush3.bf16.msra.mxu0 %v644_v8  ;;  %592 = vmatpush3.bf16.msra.mxu1 %v645_v9  ;;  %v666_v36 = vld [vmem:[#allocation10 + $0x28] sm:$0xff]   ;;  %v667_v37 = vld [vmem:[#allocation10 + $0x30] sm:$0xff]   ;;  %v668_v38 = vld [vmem:[#allocation10 + $0x38] sm:$0xff]  }
  0x65   :  { %553 = vmatprep.subr.bf16.mxu0 %v646_v10  ;;  %593 = vmatprep.subr.bf16.mxu1 %v820_v0  ;;  %v512_v41 = vld [vmem:[%s978_s4] ss:$0 sm:$0xff] }
  0x66   :  { %327 = vmatprep.mubr.bf16.mxu0 %v93_v24  ;;  %v538_v57 = vld [vmem:[%s980_s6] ss:$0 sm:$0xff] }
  0x68   :  { %554 = vmatpush3.bf16.msra.mxu0 %v647_v11  ;;  %594 = vmatpush3.bf16.msra.mxu1 %v648_v12 }
  0x69   :  { %555 = vmatprep.subr.bf16.mxu0 %v649_v13  ;;  %595 = vmatprep.subr.bf16.mxu1 %v820_v0 }
  0x6c   :  { %556 = vmatpush3.bf16.msra.mxu0 %v650_v14  ;;  %596 = vmatpush3.bf16.msra.mxu1 %v651_v15 }
  0x6d   :  { %557 = vmatprep.subr.bf16.mxu0 %v652_v16  ;;  %597 = vmatprep.subr.bf16.mxu1 %v820_v0 }
  0x70   :  { %558 = vmatpush3.bf16.msra.mxu0 %v653_v17  ;;  %598 = vmatpush3.bf16.msra.mxu1 %v654_v18 }
  0x71   :  { %559 = vmatprep.subr.bf16.mxu0 %v655_v19  ;;  %599 = vmatprep.subr.bf16.mxu1 %v820_v0 }
  0x74   :  { %560 = vmatpush3.bf16.msra.mxu0 %v656_v20  ;;  %600 = vmatpush3.bf16.msra.mxu1 %v657_v22 }
  0x75   :  { %561 = vmatprep.subr.bf16.mxu0 %v658_v23  ;;  %601 = vmatprep.subr.bf16.mxu1 %v820_v0 }
  0x78   :  { %562 = vmatpush3.bf16.msra.mxu0 %v659_v25  ;;  %602 = vmatpush3.bf16.msra.mxu1 %v660_v27 }
  0x79   :  { %607 = vmatprep.subr.bf16.mxu0 %v820_v0 }
  0x7b   :  { %328 = vmatmul.mubr.bf16.vlgmr.msra.gmra.mrb[0].mxu0 %v91_v29  ;;  %604 = vmatmul.mubr.bf16.vlgmr.msra.gmra.mrb[0].mxu1 %v95_v30 }
  0x7c   :  { %623 = vmatprep.mubr.msk.bf16.mxu0 %vm821_vm0, %v820_v0  ;;  %608 = vmatpush3.bf16.msra.mxu0 %v661_v31 }
  0x7d   :  { %609 = vmatprep.subr.bf16.mxu0 %v820_v0 }
  0x80   :  { %610 = vmatpush3.bf16.msra.mxu0 %v662_v32 }
  0x81   :  { %611 = vmatprep.subr.bf16.mxu0 %v820_v0 }
  0x84   :  { %612 = vmatpush3.bf16.msra.mxu0 %v663_v33 }
  0x85   :  { %613 = vmatprep.subr.bf16.mxu0 %v820_v0 }
  0x88   :  { %614 = vmatpush3.bf16.msra.mxu0 %v664_v34 }
  0x89   :  { %615 = vmatprep.subr.bf16.mxu0 %v820_v0 }
  0x8c   :  { %616 = vmatpush3.bf16.msra.mxu0 %v665_v35 }
  0x8d   :  { %617 = vmatprep.subr.bf16.mxu0 %v820_v0 }
  0x90   :  { %618 = vmatpush3.bf16.msra.mxu0 %v666_v36 }
  0x91   :  { %619 = vmatprep.subr.bf16.mxu0 %v820_v0 }
  0x94   :  { %620 = vmatpush3.bf16.msra.mxu0 %v667_v37 }
  0x95   :  { %621 = vmatprep.subr.bf16.mxu0 %v820_v0 }
  0x98   :  { %622 = vmatpush3.bf16.msra.mxu0 %v668_v38 }
 0x14e   :  { %v563_v39 = vpop.f32.mrb[0].mxu0  ;;  %v369_v42 = vpop.f32.mrb[0].mxu1 }
 0x14f   :  { %v564_v40 = vpop.f32.mrb[1].mxu0  ;;  %v605_v45 = vpop.f32.mrb[1].mxu1 }
 0x150   :  { %v565_v43 = vadd.f32 %v564_v40, %v563_v39  ;;  %v566_v44 = vpop.f32.mrb[2].mxu0  ;;  %v372_v47 = vpop.f32.mrb[2].mxu1 }
 0x151   :  { %v567_v46 = vpop.f32.mrb[3].mxu0  ;;  %v606_v49 = vpop.f32.mrb[3].mxu1 }
 0x152   :  { %v330_v48 = vadd.f32 %v565_v43, %v512_v41 }
 0x154   :  { %v370_v50 = vadd.f32 %v369_v42, %v330_v48 }
 0x156   :  { %v537_v51 = vmul.f32 -1.442695, %v370_v50 }
 0x158   :  { %669 = vpow2.f32 %v537_v51 }
 0x162   :  { %v670_v52 = vpop.eup %669 }
 0x163   :  { %v378_v53 = vadd.f32 1.0, %v670_v52 }
 0x165   :  { %671 = vrcp.f32 %v378_v53 }
 0x16f   :  { %v672_v54 = vpop.eup %671 }
 0x170   :  { %v381_v55 = vmul.f32 %v672_v54, %v370_v50 }
 0x172   :  { %v382_v56 = vpack.c.bf16 %v381_v55, %v381_v55 }
 0x174   :  { %624 = vmatmul.mubr.bf16.vlgmr.msra.gmra.mrb[4].mxu0 %v382_v56 }
 0x247   :  { %v488_v58 = vpop.f32.mrb[4].mxu0 }
 0x248   :  { %v489_v59 = vadd.f32 %v538_v57, %v488_v58  ;;  %v625_v60 = vpop.f32.mrb[5].mxu0 }
 0x249   :  { %v491_v61 = vpop.f32.mrb[6].mxu0 }
 0x24a   :  { %494 = vst [vmem:[#allocation11] sm:$0xff] %v489_v59  ;;  %v626_v62 = vpop.f32.mrb[7].mxu0 }
 0x24b   :  { %794 = shalt.err (!%p791_p2)
}
 0x24c   :  { %s795_s6 = scalar_lea.hbm %s981_s7, 128 }
 0x24d   :  { %p796_p3 = scmp.ne.s32.totalorder %s981_s7, %s795_s6  ;;  %p799_p4 = scmp.lt.u32.totalorder %s795_s6, %s981_s7 }
 0x24f   :  { %p801_p5 = pnand %p799_p4, %p796_p3 }
 0x251   :  { %804 = shalt.err (!%p801_p5)
}
 0x252   :  { %504 = dma.vmem_to_hbm [thread:$0]  %s502_s27, 128, %s981_s7, [#allocation4]  }
 0x253   :  { %811 = dma.done.wait [#allocation4], 128  }
 0x254   :  { %812 = vsyncadd [#allocation4], 4294967168 }
 0x255   :  { %508 = vsyncpa [#allocation3], 1 }
 0x256   :  { %509 = vsyncpa [#allocation6], 1 }
 0x257   :  { %510 = vsyncpa [#allocation9], 1 }
 0x258   :  { %511 = vsyncpa [#allocation4], 1 }

</bundles_post_ra>
